<compile_context>
chip_gen: v7x
topology: tpu7x:2x2x1
jax: 0.10.0
libtpu: 0.0.40
codegen_flags: <defaults>
</compile_context>

<pallas_src>
import jax
import jax.numpy as jnp
from jax.experimental import pallas as pl
from jax.experimental.pallas import tpu as pltpu


def _round_up(n, m):
    return ((n + m - 1) // m) * m


def _plan_axis(n, target, granule):
    """Pick (tile, padded_total) for one node axis.

    Single tile equal to the (granule-rounded) full dim when it fits under
    `target`, otherwise `target`-sized tiles (target must satisfy the
    (8,128)/full-dim BlockSpec rule for the axes it is used on).
    """
    n_g = _round_up(n, granule)
    if n_g <= target:
        return n_g, n_g
    return target, _round_up(n, target)


def _make_layer_kernel(apply_relu):
    """One SAGEConv(mean) layer; grid = (dst_tiles, src_tiles)."""

    def kernel(a_ref, hk_ref, hself_ref, invdeg_ref, ws_ref, wn_ref, b_ref,
               o_ref, acc_ref):
        k = pl.program_id(1)

        @pl.when(k == 0)
        def _init():
            acc_ref[...] = jnp.zeros_like(acc_ref)

        # neighbor SUM: 0/1 bf16 adjacency tile @ bf16 features, f32 accumulate
        acc_ref[...] += jnp.dot(a_ref[...], hk_ref[...],
                                preferred_element_type=jnp.float32)

        @pl.when(k == pl.num_programs(1) - 1)
        def _epilogue():
            # mean = sum * (1/deg) in f32, then two accumulating MXU matmuls
            # (no lane-axis concat copy; weights stay unstacked)
            h_neigh = (acc_ref[...] * invdeg_ref[...]).astype(jnp.bfloat16)
            z = (jnp.dot(hself_ref[...], ws_ref[...],
                         preferred_element_type=jnp.float32)
                 + jnp.dot(h_neigh, wn_ref[...],
                           preferred_element_type=jnp.float32)
                 + b_ref[...])
            if apply_relu:
                z = jnp.maximum(z, 0.0)
            o_ref[...] = z.astype(o_ref.dtype)

    return kernel


def sage_p3_forward(blocks, feat, params, *, tm_target=256, tk_target=512):
    """Eval-mode SageP3.forward(blocks, feat).

    blocks: list of dense row-normalized aggregation matrices (dst_l, src_l) f32
            (A[i, j] = 1/in_deg(i) for edge j->i, else 0); dst nodes lead src.
    feat:   (src_0, hid_feats) f32  (P3: layer 0 computed remotely)
    params: list of (w_self_t, w_neigh_t, bias); w_*_t is (in_l, out_l)
    tm_target: dst-row tile (multiple of 256 for v6e/v7x MXU; 128 ok on v5e)
    tk_target: src/K tile (must be a multiple of 128)
    """
    L = len(params)
    assert len(blocks) == L
    dst = [a.shape[0] for a in blocks]
    src = [a.shape[1] for a in blocks]
    assert src[0] == feat.shape[0]
    for l in range(1, L):
        assert src[l] == dst[l - 1]

    fdims = [feat.shape[1]] + [w.shape[1] for w, _, _ in params]
    fpad = [_round_up(f, 128) for f in fdims]

    # layer-0 input features: bf16, lane-padded to 128
    h = jnp.pad(feat, ((0, 0), (0, fpad[0] - fdims[0]))).astype(jnp.bfloat16)

    for l in range(L):
        w_self_t, w_neigh_t, b = params[l]
        fin, fout = fdims[l], fdims[l + 1]
        fin_p, fout_p = fpad[l], fpad[l + 1]

        # node-axis tiling: dst (M, "parallel") and src (K, "arbitrary");
        # granule 16 matches bf16's native (16,128) sublane packing.
        tm, dst_p = _plan_axis(dst[l], tm_target, 16)
        tk, src_p = _plan_axis(src[l], tk_target, 16)

        # exact 0/1 bf16 adjacency mask + f32 reciprocal in-degree.
        # TODO(synk): materialize these (or a sparse form) once upstream so the
        #             pad+cast pass over A is not repeated every forward call.
        a = blocks[l]
        mask01 = jnp.pad((a > 0).astype(jnp.bfloat16),
                         ((0, dst_p - dst[l]), (0, src_p - src[l])))
        deg = (a > 0).sum(axis=1, keepdims=True).astype(jnp.float32)
        invdeg = jnp.pad(jnp.where(deg > 0, 1.0 / deg, 0.0),
                         ((0, dst_p - dst[l]), (0, 0)))

        ws = jnp.pad(w_self_t, ((0, fin_p - fin), (0, fout_p - fout))
                     ).astype(jnp.bfloat16)
        wn = jnp.pad(w_neigh_t, ((0, fin_p - fin), (0, fout_p - fout))
                     ).astype(jnp.bfloat16)
        bp = jnp.pad(b.reshape(1, -1), ((0, 0), (0, fout_p - fout))
                     ).astype(jnp.float32)

        # source features must cover both the K tiles and the dst-self rows
        need_rows = max(src_p, dst_p)
        if h.shape[0] < need_rows:
            h = jnp.pad(h, ((0, need_rows - h.shape[0]), (0, 0)))

        grid = (dst_p // tm, src_p // tk)
        last = (l == L - 1)
        out_dtype = jnp.float32 if last else jnp.bfloat16

        flops = 2 * dst_p * src_p * fin_p + 2 * 2 * dst_p * fin_p * fout_p
        bytes_acc = (dst_p * src_p * 2                     # A mask
                     + grid[0] * src_p * fin_p * 2         # streamed h (per i tile)
                     + dst_p * fin_p * 2                   # h_self
                     + 2 * fin_p * fout_p * 2              # weights
                     + fout_p * 4 + dst_p * 4              # bias, 1/deg
                     + dst_p * fout_p * jnp.dtype(out_dtype).itemsize)

        # explicit scoped-VMEM budget: double-buffered tiles + f32 accumulator
        est = (2 * tm * tk * 2            # A tile
               + 2 * tk * fin_p * 2       # h K-stream tile
               + 2 * tm * fin_p * 2       # h_self tile
               + 2 * tm * 128 * 4         # 1/deg (lane-padded)
               + 2 * 2 * fin_p * fout_p * 2
               + 2 * fout_p * 4
               + 2 * tm * fout_p * 4      # output tile
               + tm * fin_p * 4)          # accumulator scratch
        vmem_limit = int(min(max(2 * est + (4 << 20), 16 << 20), 48 << 20))

        h = pl.pallas_call(
            _make_layer_kernel(apply_relu=not last),
            out_shape=jax.ShapeDtypeStruct((dst_p, fout_p), out_dtype),
            grid_spec=pltpu.PrefetchScalarGridSpec(
                num_scalar_prefetch=0,
                grid=grid,
                in_specs=[
                    pl.BlockSpec((tm, tk), lambda i, k: (i, k)),         # A tile
                    pl.BlockSpec((tk, fin_p), lambda i, k: (k, 0)),      # h (K stream)
                    pl.BlockSpec((tm, fin_p), lambda i, k: (i, 0)),      # h_self (resident over k)
                    pl.BlockSpec((tm, 1), lambda i, k: (i, 0)),          # 1/deg (resident over k)
                    pl.BlockSpec((fin_p, fout_p), lambda i, k: (0, 0)),  # W_self (resident)
                    pl.BlockSpec((fin_p, fout_p), lambda i, k: (0, 0)),  # W_neigh (resident)
                    pl.BlockSpec((1, fout_p), lambda i, k: (0, 0)),      # bias (resident)
                ],
                out_specs=pl.BlockSpec((tm, fout_p), lambda i, k: (i, 0)),
                scratch_shapes=[pltpu.VMEM((tm, fin_p), jnp.float32)],
            ),
            compiler_params=pltpu.CompilerParams(
                dimension_semantics=("parallel", "arbitrary"),
                vmem_limit_bytes=vmem_limit),
            cost_estimate=pl.CostEstimate(
                flops=flops, transcendentals=0, bytes_accessed=bytes_acc),
        )(mask01, h, h, invdeg, ws, wn, bp)

    return h[:dst[-1], :fdims[-1]]


if __name__ == "__main__":
    key = jax.random.PRNGKey(0)

    # num_layers=3 -> layer 0 skipped (P3) -> 2 SAGEConv layers: hid->hid, hid->out
    in_feats, hid_feats, out_feats, num_layers = 64, 32, 16, 3
    num_src0, num_dst0, num_dst1 = 24, 16, 8   # sampled-block node counts

    k_feat, k_adj0, k_adj1, k_w = jax.random.split(key, 4)

    # P3: layer 0 computed remotely, so feat already has hid_feats channels
    feat = jax.random.normal(k_feat, (num_src0, hid_feats), jnp.float32)

    def make_block(k, ndst, nsrc):
        edges = (jax.random.uniform(k, (ndst, nsrc)) < 0.4).astype(jnp.float32)
        # dst node i is src node i in a DGL block; guarantee at least one edge
        edges = edges.at[jnp.arange(ndst), jnp.arange(ndst)].set(1.0)
        deg = edges.sum(axis=1, keepdims=True)
        return edges / jnp.maximum(deg, 1.0)       # row-normalized -> mean agg

    blocks = [make_block(k_adj0, num_dst0, num_src0),
              make_block(k_adj1, num_dst1, num_dst0)]

    # SAGEConv layer shapes: (hid -> hid), (hid -> out); weights pre-transposed
    layer_dims = [(hid_feats, hid_feats), (hid_feats, out_feats)]
    params = []
    wkeys = jax.random.split(k_w, len(layer_dims) * 3)
    for i, (din, dout) in enumerate(layer_dims):
        ks, kn, kb = wkeys[3 * i:3 * i + 3]
        scale = (2.0 / (din + dout)) ** 0.5        # xavier-ish, deterministic
        w_self_t = scale * jax.random.normal(ks, (din, dout), jnp.float32)
        w_neigh_t = scale * jax.random.normal(kn, (din, dout), jnp.float32)
        bias = 0.1 * jax.random.normal(kb, (1, dout), jnp.float32)
        params.append((w_self_t, w_neigh_t, bias))

    out = jax.block_until_ready(sage_p3_forward(blocks, feat, params))
    assert out.shape == (num_dst1, out_feats)

    # plain-JAX reference along the same numeric path:
    # bf16 MXU inputs, f32 accumulate, exact 0/1 mask + f32 1/deg scale,
    # bf16 intermediate activations.
    bf16 = jnp.bfloat16
    h_ref = feat.astype(bf16)
    for i, (a, (ws, wn, b)) in enumerate(zip(blocks, params)):
        d = a.shape[0]
        mask = (a > 0).astype(bf16)
        deg = (a > 0).sum(axis=1, keepdims=True).astype(jnp.float32)
        invdeg = jnp.where(deg > 0, 1.0 / deg, 0.0)
        hn = (jnp.dot(mask, h_ref, preferred_element_type=jnp.float32)
              * invdeg).astype(bf16)
        z = (jnp.dot(h_ref[:d], ws.astype(bf16),
                     preferred_element_type=jnp.float32)
             + jnp.dot(hn, wn.astype(bf16),
                       preferred_element_type=jnp.float32)
             + b.reshape(1, -1))
        if i != len(params) - 1:
            h_ref = jnp.maximum(z, 0.0).astype(bf16)
        else:
            h_ref = z

    assert jnp.allclose(out, h_ref, atol=2e-2, rtol=2e-2), \
        float(jnp.max(jnp.abs(out - h_ref)))

    print("KERNEL_OK")
</pallas_src>

<mosaic_0001>
module attributes {stable_mosaic.version = 11 : i64} {
  func.func @kernel(%arg0: i32, %arg1: i32, %arg2: memref<16x32xbf16, #tpu.memory_space<vmem>>, %arg3: memref<32x128xbf16, #tpu.memory_space<vmem>>, %arg4: memref<16x128xbf16, #tpu.memory_space<vmem>>, %arg5: memref<16x1xf32, #tpu.memory_space<vmem>>, %arg6: memref<128x128xbf16, #tpu.memory_space<vmem>>, %arg7: memref<128x128xbf16, #tpu.memory_space<vmem>>, %arg8: memref<1x128xf32, #tpu.memory_space<vmem>>, %arg9: memref<16x128xbf16, #tpu.memory_space<vmem>>, %arg10: memref<16x128xf32, #tpu.memory_space<vmem>>) attributes {dimension_semantics = [#tpu.dimension_semantics<parallel>, #tpu.dimension_semantics<arbitrary>], iteration_bounds = array<i64: 1, 1>, scalar_prefetch = 0 : i64, scratch_operands = 1 : i64, tpu.core_type = #tpu.core_type<tc>, window_params = [{transform_indices = @transform_0, window_bounds = array<i64: 16, 32>}, {transform_indices = @transform_1, window_bounds = array<i64: 32, 128>}, {transform_indices = @transform_2, window_bounds = array<i64: 16, 128>}, {transform_indices = @transform_3, window_bounds = array<i64: 16, 1>}, {pipeline_mode = #tpu.pipeline_mode<synchronous>, transform_indices = @transform_4, window_bounds = array<i64: 128, 128>}, {pipeline_mode = #tpu.pipeline_mode<synchronous>, transform_indices = @transform_5, window_bounds = array<i64: 128, 128>}, {pipeline_mode = #tpu.pipeline_mode<synchronous>, transform_indices = @transform_6, window_bounds = array<i64: 1, 128>}, {transform_indices = @transform_7, window_bounds = array<i64: 16, 128>}]} {
    %c0_i32 = arith.constant 0 : i32
    %0 = arith.cmpi eq, %arg1, %c0_i32 : i32
    %1 = arith.extui %0 : i1 to i32
    %c0_i32_0 = arith.constant 0 : i32
    %2 = arith.cmpi ne, %1, %c0_i32_0 : i32
    scf.if %2 {
      %cst_10 = arith.constant 0.000000e+00 : f32
      %12 = vector.broadcast %cst_10 : f32 to vector<16x128xf32>
      %c0_11 = arith.constant 0 : index
      %c0_12 = arith.constant 0 : index
      %13 = vector.load %arg10[%c0_11, %c0_12] : memref<16x128xf32, #tpu.memory_space<vmem>>, vector<16x128xf32>
      tpu.vector_store %arg10[%c0_11, %c0_12], %12 {strides = array<i32>} : memref<16x128xf32, #tpu.memory_space<vmem>>, vector<16x128xf32>,
    } else {
    }
    %c0 = arith.constant 0 : index
    %c0_1 = arith.constant 0 : index
    %3 = vector.load %arg10[%c0, %c0_1] : memref<16x128xf32, #tpu.memory_space<vmem>>, vector<16x128xf32>
    %c0_2 = arith.constant 0 : index
    %c0_3 = arith.constant 0 : index
    %4 = vector.load %arg2[%c0_2, %c0_3] : memref<16x32xbf16, #tpu.memory_space<vmem>>, vector<16x32xbf16>
    %c0_4 = arith.constant 0 : index
    %c0_5 = arith.constant 0 : index
    %5 = vector.load %arg3[%c0_4, %c0_5] : memref<32x128xbf16, #tpu.memory_space<vmem>>, vector<32x128xbf16>
    %cst = arith.constant dense<0.000000e+00> : vector<16x128xf32>
    %6 = tpu.matmul %4, %5, %cst {dimension_numbers = #tpu.dot_dimension_numbers<[1], [0], [0], [1], [0, 0, 1, 1], [], []>} : vector<16x32xbf16>, vector<32x128xbf16>, vector<16x128xf32> -> vector<16x128xf32>
    %7 = arith.addf %3, %6 : vector<16x128xf32>
    %c0_6 = arith.constant 0 : index
    %c0_7 = arith.constant 0 : index
    %8 = vector.load %arg10[%c0_6, %c0_7] : memref<16x128xf32, #tpu.memory_space<vmem>>, vector<16x128xf32>
    tpu.vector_store %arg10[%c0_6, %c0_7], %7 {strides = array<i32>} : memref<16x128xf32, #tpu.memory_space<vmem>>, vector<16x128xf32>,
    %c0_i32_8 = arith.constant 0 : i32
    %9 = arith.cmpi eq, %arg1, %c0_i32_8 : i32
    %10 = arith.extui %9 : i1 to i32
    %c0_i32_9 = arith.constant 0 : i32
    %11 = arith.cmpi ne, %10, %c0_i32_9 : i32
    scf.if %11 {
      %c0_10 = arith.constant 0 : index
      %c0_11 = arith.constant 0 : index
      %12 = vector.load %arg10[%c0_10, %c0_11] : memref<16x128xf32, #tpu.memory_space<vmem>>, vector<16x128xf32>
      %c0_12 = arith.constant 0 : index
      %c0_13 = arith.constant 0 : index
      %13 = vector.load %arg5[%c0_12, %c0_13] : memref<16x1xf32, #tpu.memory_space<vmem>>, vector<16x1xf32>
      %14 = vector.broadcast %13 : vector<16x1xf32> to vector<16x128xf32>
      %15 = arith.mulf %12, %14 : vector<16x128xf32>
      %16 = arith.truncf %15 : vector<16x128xf32> to vector<16x128xbf16>
      %c0_14 = arith.constant 0 : index
      %c0_15 = arith.constant 0 : index
      %17 = vector.load %arg4[%c0_14, %c0_15] : memref<16x128xbf16, #tpu.memory_space<vmem>>, vector<16x128xbf16>
      %c0_16 = arith.constant 0 : index
      %c0_17 = arith.constant 0 : index
      %18 = vector.load %arg6[%c0_16, %c0_17] : memref<128x128xbf16, #tpu.memory_space<vmem>>, vector<128x128xbf16>
      %cst_18 = arith.constant dense<0.000000e+00> : vector<16x128xf32>
      %19 = tpu.matmul %17, %18, %cst_18 {dimension_numbers = #tpu.dot_dimension_numbers<[1], [0], [0], [1], [0, 0, 1, 1], [], []>} : vector<16x128xbf16>, vector<128x128xbf16>, vector<16x128xf32> -> vector<16x128xf32>
      %c0_19 = arith.constant 0 : index
      %c0_20 = arith.constant 0 : index
      %20 = vector.load %arg7[%c0_19, %c0_20] : memref<128x128xbf16, #tpu.memory_space<vmem>>, vector<128x128xbf16>
      %cst_21 = arith.constant dense<0.000000e+00> : vector<16x128xf32>
      %21 = tpu.matmul %16, %20, %cst_21 {dimension_numbers = #tpu.dot_dimension_numbers<[1], [0], [0], [1], [0, 0, 1, 1], [], []>} : vector<16x128xbf16>, vector<128x128xbf16>, vector<16x128xf32> -> vector<16x128xf32>
      %22 = arith.addf %19, %21 : vector<16x128xf32>
      %c0_22 = arith.constant 0 : index
      %c0_23 = arith.constant 0 : index
      %23 = vector.load %arg8[%c0_22, %c0_23] : memref<1x128xf32, #tpu.memory_space<vmem>>, vector<1x128xf32>
      %24 = vector.broadcast %23 : vector<1x128xf32> to vector<16x128xf32>
      %25 = arith.addf %22, %24 : vector<16x128xf32>
      %cst_24 = arith.constant 0.000000e+00 : f32
      %26 = vector.broadcast %cst_24 : f32 to vector<16x128xf32>
      %27 = arith.maximumf %25, %26 : vector<16x128xf32>
      %28 = arith.truncf %27 : vector<16x128xf32> to vector<16x128xbf16>
      %c0_25 = arith.constant 0 : index
      %c0_26 = arith.constant 0 : index
      %29 = vector.load %arg9[%c0_25, %c0_26] : memref<16x128xbf16, #tpu.memory_space<vmem>>, vector<16x128xbf16>
      tpu.vector_store %arg9[%c0_25, %c0_26], %28 {strides = array<i32>} : memref<16x128xbf16, #tpu.memory_space<vmem>>, vector<16x128xbf16>,
    } else {
    }
    return
  }
  func.func @transform_0(%arg0: i32, %arg1: i32) -> (i32, i32) {
    %c0_i32 = arith.constant 0 : i32
    return %arg0, %arg1 : i32, i32
  }
  func.func @transform_1(%arg0: i32, %arg1: i32) -> (i32, i32) {
    %c0_i32 = arith.constant 0 : i32
    %c0_i32_0 = arith.constant 0 : i32
    return %arg1, %c0_i32 : i32, i32
  }
  func.func @transform_2(%arg0: i32, %arg1: i32) -> (i32, i32) {
    %c0_i32 = arith.constant 0 : i32
    %c0_i32_0 = arith.constant 0 : i32
    return %arg0, %c0_i32 : i32, i32
  }
  func.func @transform_3(%arg0: i32, %arg1: i32) -> (i32, i32) {
    %c0_i32 = arith.constant 0 : i32
    %c0_i32_0 = arith.constant 0 : i32
    return %arg0, %c0_i32 : i32, i32
  }
  func.func @transform_4(%arg0: i32, %arg1: i32) -> (i32, i32) {
    %c0_i32 = arith.constant 0 : i32
    %c0_i32_0 = arith.constant 0 : i32
    %c0_i32_1 = arith.constant 0 : i32
    return %c0_i32, %c0_i32_0 : i32, i32
  }
  func.func @transform_5(%arg0: i32, %arg1: i32) -> (i32, i32) {
    %c0_i32 = arith.constant 0 : i32
    %c0_i32_0 = arith.constant 0 : i32
    %c0_i32_1 = arith.constant 0 : i32
    return %c0_i32, %c0_i32_0 : i32, i32
  }
  func.func @transform_6(%arg0: i32, %arg1: i32) -> (i32, i32) {
    %c0_i32 = arith.constant 0 : i32
    %c0_i32_0 = arith.constant 0 : i32
    %c0_i32_1 = arith.constant 0 : i32
    return %c0_i32, %c0_i32_0 : i32, i32
  }
  func.func @transform_7(%arg0: i32, %arg1: i32) -> (i32, i32) {
    %c0_i32 = arith.constant 0 : i32
    %c0_i32_0 = arith.constant 0 : i32
    return %arg0, %c0_i32 : i32, i32
  }
}

</mosaic_0001>

<bundles_post_ra>
// kernel: tpu_custom_call.1
= control target key start
LH: loop header
LB: loop body
LE: loop exit
PB: predicated region body
PF: predicated region fallthrough
CT: control target
= control target key end

     0   :  { %12 = vsyncpa [#allocation4], 0  ;;  %s871_s0 = inlined_call_operand.hbm [shape: bf16[16,32], index: 0, kind: input, shape index: {}]   ;;  %s872_s1 = inlined_call_operand.vmem [shape: bf16[32,128], index: 1, kind: input, shape index: {}]   ;;  %s873_s2 = inlined_call_operand.hbm [shape: bf16[32,128], index: 2, kind: input, shape index: {}]   ;;  %s874_s3 = inlined_call_operand.vmem [shape: f32[16,1], index: 3, kind: input, shape index: {}]   ;;  %s875_s4 = inlined_call_operand.hbm [shape: bf16[128,128], index: 4, kind: input, shape index: {}]   ;;  %s876_s5 = inlined_call_operand.hbm [shape: bf16[128,128], index: 5, kind: input, shape index: {}]   ;;  %s877_s6 = inlined_call_operand.vmem [shape: f32[1,128], index: 6, kind: input, shape index: {}]   ;;  %s878_s7 = inlined_call_operand.hbm [shape: bf16[16,128], index: 7, kind: output, shape index: {}]  }
   0x1   :  { %13 = vsyncpa [#allocation7], 0 }
   0x2   :  { %14 = vsyncpa [#allocation10], 0 }
   0x3   :  { %15 = vsyncpa [#allocation5], 0  ;;  %s690_s24 = smov [#allocation6]   ;;  %s691_s26 = smov [#allocation3]  }
   0x4   :  { %s35_s25 = sshll.u32 %s690_s24, 4  ;;  %s21_s27 = sshll.u32 %s691_s26, 4  ;;  %s36_s25 = int_to_ptr.vmem [resolvable:$true] %s35_s25  ;;  %s740_s27 = int_to_ptr.vmem [resolvable:$true] %s21_s27 }
   0x5   :  { %s572_s30 = scalar_lea.hbm %s873_s2, 128  ;;  %s574_s12 = scalar_lea.hbm %s873_s2, 256 }
   0x6   :  { %p573_p0 = scmp.ne.s32.totalorder %s873_s2, %s572_s30  ;;  %p575_p1 = scmp.lt.u32.totalorder %s574_s12, %s572_s30 }
   0x7   :  { %p576_p2 = scmp.lt.u32.totalorder %s572_s30, %s873_s2 }
   0x9   :  { %p577_p3 = por %p576_p2, %p575_p1 }
   0xb   :  { %p578_p4 = pnand %p577_p3, %p573_p0 }
   0xd   :  { %581 = shalt.err (!%p578_p4)
}
   0xe   :  { %s582_s15 = scalar_lea.vmem %s36_s25, 128  ;;  %p587_p6 = scmp.lt.s32.totalorder %s36_s25, %s36_s25 }
   0xf   :  { %p583_p5 = scmp.ne.s32.totalorder %s36_s25, %s582_s15  ;;  %p588_p7 = scmp.lt.s32.totalorder %s582_s15, %s582_s15 }
  0x11   :  { %p589_p8 = por %p588_p7, %p587_p6 }
  0x13   :  { %p590_p9 = pnand %p589_p8, %p583_p5 }
  0x15   :  { %593 = shalt.err (!%p590_p9)
}
  0x16   :  { %s692_s16 = smov 64   ;;  %s693_s17 = smov 4  }
  0x17   :  { %41 = dma.hbm_to_vmem [thread:$0]  %s873_s2, 128, %s36_s25, [#allocation7], %s692_s16, %s692_s16, %s693_s17  }
  0x18   :  { %s594_s22 = scalar_lea.hbm %s871_s0, 128 }
  0x19   :  { %p595_p10 = scmp.ne.s32.totalorder %s871_s0, %s594_s22  ;;  %p598_p11 = scmp.lt.u32.totalorder %s594_s22, %s871_s0 }
  0x1b   :  { %p600_p12 = pnand %p598_p11, %p595_p10 }
  0x1d   :  { %603 = shalt.err (!%p600_p12)
}
  0x1e   :  { %s604_s29 = scalar_lea.vmem %s740_s27, 128  ;;  %p609_p0 = scmp.lt.s32.totalorder %s740_s27, %s740_s27 }
  0x1f   :  { %p605_p13 = scmp.ne.s32.totalorder %s740_s27, %s604_s29  ;;  %p610_p1 = scmp.lt.s32.totalorder %s604_s29, %s604_s29 }
  0x21   :  { %p611_p2 = por %p610_p1, %p609_p0 }
  0x23   :  { %p612_p3 = pnand %p611_p2, %p605_p13 }
  0x25   :  { %615 = shalt.err (!%p612_p3)
}
  0x26   :  { %27 = dma.hbm_to_vmem [thread:$0]  %s871_s0, 128, %s740_s27, [#allocation4], %s692_s16, %s692_s16, %s693_s17  }
  0x27   :  { %s694_s30 = smov [#allocation8]   ;;  %s695_s9 = smov [#allocation9]  }
  0x28   :  { %s49_s8 = sshll.u32 %s694_s30, 4  ;;  %s61_s10 = sshll.u32 %s695_s9, 4  ;;  %s50_s8 = int_to_ptr.vmem [resolvable:$true] %s49_s8  ;;  %s780_s10 = int_to_ptr.vmem [resolvable:$true] %s61_s10 }
  0x29   :  { %s616_s13 = scalar_lea.hbm %s875_s4, 1024 }
  0x2a   :  { %p617_p4 = scmp.ne.s32.totalorder %s875_s4, %s616_s13  ;;  %p620_p5 = scmp.lt.u32.totalorder %s616_s13, %s875_s4 }
  0x2c   :  { %p622_p6 = pnand %p620_p5, %p617_p4 }
  0x2e   :  { %625 = shalt.err (!%p622_p6)
}
  0x2f   :  { %s626_s0 = scalar_lea.vmem %s50_s8, 1024  ;;  %p631_p8 = scmp.lt.s32.totalorder %s50_s8, %s50_s8 }
  0x30   :  { %p627_p7 = scmp.ne.s32.totalorder %s50_s8, %s626_s0  ;;  %p632_p9 = scmp.lt.s32.totalorder %s626_s0, %s626_s0 }
  0x32   :  { %p633_p10 = por %p632_p9, %p631_p8 }
  0x34   :  { %p634_p11 = pnand %p633_p10, %p627_p7 }
  0x36   :  { %637 = shalt.err (!%p634_p11)
}
  0x37   :  { %55 = dma.hbm_to_vmem [thread:$0]  %s875_s4, 1024, %s50_s8, [#allocation7], %s692_s16, %s692_s16, %s693_s17  }
  0x38   :  { %s638_s23 = scalar_lea.hbm %s876_s5, 1024 }
  0x39   :  { %p639_p12 = scmp.ne.s32.totalorder %s876_s5, %s638_s23  ;;  %p642_p13 = scmp.lt.u32.totalorder %s638_s23, %s876_s5 }
  0x3b   :  { %p644_p0 = pnand %p642_p13, %p639_p12 }
  0x3d   :  { %647 = shalt.err (!%p644_p0)
}
  0x3e   :  { %s648_s2 = scalar_lea.vmem %s780_s10, 1024  ;;  %p653_p2 = scmp.lt.s32.totalorder %s780_s10, %s780_s10 }
  0x3f   :  { %p649_p1 = scmp.ne.s32.totalorder %s780_s10, %s648_s2  ;;  %p654_p3 = scmp.lt.s32.totalorder %s648_s2, %s648_s2 }
  0x41   :  { %p655_p4 = por %p654_p3, %p653_p2 }
  0x43   :  { %p656_p5 = pnand %p655_p4, %p649_p1 }
  0x45   :  { %659 = shalt.err (!%p656_p5)
}
  0x46   :  { %67 = dma.hbm_to_vmem [thread:$0]  %s876_s5, 1024, %s780_s10, [#allocation10], %s692_s16, %s692_s16, %s693_s17  }
  0x47   :  { %682 = dma.done.wait [#allocation4], 128  }
  0x48   :  { %683 = vsyncadd [#allocation4], 4294967168 }
  0x49   :  { %684 = dma.done.wait [#allocation7], 1152  }
  0x4a   :  { %685 = vsyncadd [#allocation7], 4294966144 }
  0x4b   :  { %686 = dma.done.wait [#allocation10], 1024  }
  0x4c   :  { %687 = vsyncadd [#allocation10], 4294966272  ;;  %v696_v0 = vmov 0.0   ;;  %vm697_vm0 = vmmov 0   ;;  %v698_v1 = vmov 0   ;;  %v552_v2 = vld [vmem:[%s872_s1] sm:$0xff]  }
  0x4d   :  { %493 = vmatprep.subr.bf16.mxu0 %v696_v0  ;;  %497 = vmatprep.mubr.msk.bf16.mxu0 %vm697_vm0, %v696_v0  ;;  %v553_v3 = vld [vmem:[%s872_s1 + $0x8] sm:$0xff]   ;;  %v554_v4 = vld [vmem:[#allocation3] sm:$0xff]   ;;  %v556_v7 = vld [vmem:[#allocation9] sm:$0xff]   ;;  %vm114_vm1 = vcmask 261120   ;;  %s699_s14 = smov [#allocation11]  }
  0x4e   :  { %551 = vset.pattern.permute.xlu0 %v698_v1  ;;  %501 = vmatprep.subr.bf16.mxu1 %v696_v0  ;;  %v168_v5 = vld [vmem:[%s874_s3] sm:$0xff]  ;;  %v169_v6 = vld [vmem:[%s874_s3 + $0x8] sm:$0xff]  ;;  %v555_v8 = vld [vmem:[#allocation8] sm:$0xff]   ;;  %s427_s15 = sshll.u32 %s699_s14, 4  ;;  %s428_s15 = int_to_ptr.vmem [resolvable:$true] %s427_s15 }
  0x4f   :  { %517 = vmatprep.mubr.msk.bf16.mxu1 %vm697_vm0, %v696_v0  ;;  %494 = vmatpush3.bf16.msra.mxu0 %v552_v2  ;;  %v558_v9 = vld [vmem:[#allocation9 + $0x8] sm:$0xff]   ;;  %v560_v11 = vld [vmem:[#allocation9 + $0x10] sm:$0xff]   ;;  %v562_v13 = vld [vmem:[#allocation9 + $0x18] sm:$0xff]   ;;  %s660_s18 = scalar_lea.vmem %s428_s15, 128  ;;  %p665_p7 = scmp.lt.s32.totalorder %s428_s15, %s428_s15 }
  0x50   :  { %495 = vmatprep.subr.bf16.mxu0 %v696_v0  ;;  %172 = vperm.xlu0 %551, %v168_v5   ;;  %v557_v10 = vld [vmem:[#allocation8 + $0x8] sm:$0xff]   ;;  %v559_v12 = vld [vmem:[#allocation8 + $0x10] sm:$0xff]   ;;  %v561_v14 = vld [vmem:[#allocation8 + $0x18] sm:$0xff]   ;;  %p661_p6 = scmp.ne.s32.totalorder %s428_s15, %s660_s18  ;;  %p666_p8 = scmp.lt.s32.totalorder %s660_s18, %s660_s18 }
  0x51   :  { %502 = vmatpush3.bf16.msra.mxu1 %v556_v7  ;;  %v564_v15 = vld [vmem:[#allocation9 + $0x20] sm:$0xff]   ;;  %v566_v17 = vld [vmem:[#allocation9 + $0x28] sm:$0xff]   ;;  %v567_v19 = vld [vmem:[#allocation8 + $0x30] sm:$0xff]  }
  0x52   :  { %503 = vmatprep.subr.bf16.mxu1 %v696_v0  ;;  %v563_v16 = vld [vmem:[#allocation8 + $0x20] sm:$0xff]   ;;  %v565_v18 = vld [vmem:[#allocation8 + $0x28] sm:$0xff]   ;;  %v568_v20 = vld [vmem:[#allocation9 + $0x30] sm:$0xff]   ;;  %p667_p9 = por %p666_p8, %p665_p7 }
  0x53   :  { %496 = vmatpush3.bf16.msra.mxu0 %v553_v3  ;;  %v569_v21 = vld [vmem:[#allocation8 + $0x38] sm:$0xff]   ;;  %v462_v38 = vld [vmem:[%s877_s6] ss:$0 sm:$0xff] }
  0x54   :  { %521 = vmatprep.subr.bf16.mxu0 %v696_v0  ;;  %177 = vperm.xlu0 %551, %v169_v6   ;;  %v570_v22 = vld [vmem:[#allocation9 + $0x38] sm:$0xff]   ;;  %p668_p10 = pnand %p667_p9, %p661_p6 }
  0x55   :  { %504 = vmatpush3.bf16.msra.mxu1 %v558_v9  ;;  %v571_v23 = vld [vmem:[#allocation6] sm:$0xff]  }
  0x56   :  { %498 = vmatmul.mubr.msk.bf16.vlgmr.msra.gmra.mrb[0].mxu0 %vm114_vm1, %v554_v4  ;;  %505 = vmatprep.subr.bf16.mxu1 %v696_v0 }
  0x57   :  { %522 = vmatpush3.bf16.msra.mxu0 %v555_v8  ;;  %537 = vmatprep.mubr.msk.bf16.mxu0 %vm697_vm0, %v696_v0 }
  0x58   :  { %523 = vmatprep.subr.bf16.mxu0 %v696_v0 }
  0x59   :  { %506 = vmatpush3.bf16.msra.mxu1 %v560_v11 }
  0x5a   :  { %507 = vmatprep.subr.bf16.mxu1 %v696_v0 }
  0x5b   :  { %524 = vmatpush3.bf16.msra.mxu0 %v557_v10 }
  0x5c   :  { %525 = vmatprep.subr.bf16.mxu0 %v696_v0 }
  0x5d   :  { %508 = vmatpush3.bf16.msra.mxu1 %v562_v13 }
  0x5e   :  { %509 = vmatprep.subr.bf16.mxu1 %v696_v0 }
  0x5f   :  { %526 = vmatpush3.bf16.msra.mxu0 %v559_v12 }
  0x60   :  { %527 = vmatprep.subr.bf16.mxu0 %v696_v0 }
  0x61   :  { %510 = vmatpush3.bf16.msra.mxu1 %v564_v15 }
  0x62   :  { %511 = vmatprep.subr.bf16.mxu1 %v696_v0 }
  0x63   :  { %528 = vmatpush3.bf16.msra.mxu0 %v561_v14 }
  0x64   :  { %529 = vmatprep.subr.bf16.mxu0 %v696_v0 }
  0x65   :  { %512 = vmatpush3.bf16.msra.mxu1 %v566_v17 }
  0x66   :  { %513 = vmatprep.subr.bf16.mxu1 %v696_v0 }
  0x67   :  { %530 = vmatpush3.bf16.msra.mxu0 %v563_v16 }
  0x68   :  { %531 = vmatprep.subr.bf16.mxu0 %v696_v0 }
  0x69   :  { %514 = vmatpush3.bf16.msra.mxu1 %v568_v20 }
  0x6a   :  { %515 = vmatprep.subr.bf16.mxu1 %v696_v0 }
  0x6b   :  { %532 = vmatpush3.bf16.msra.mxu0 %v565_v18 }
  0x6c   :  { %533 = vmatprep.subr.bf16.mxu0 %v696_v0 }
  0x6d   :  { %516 = vmatpush3.bf16.msra.mxu1 %v570_v22 }
  0x6f   :  { %534 = vmatpush3.bf16.msra.mxu0 %v567_v19 }
  0x70   :  { %535 = vmatprep.subr.bf16.mxu0 %v696_v0 }
  0x73   :  { %536 = vmatpush3.bf16.msra.mxu0 %v569_v21 }
  0x76   :  { %538 = vmatmul.mubr.bf16.vlgmr.msra.gmra.mrb[4].mxu0 %v571_v23 }
  0xcf   :  { %v173_v24 = vpop.permute.xlu0 %172 }
  0xd3   :  { %v178_v27 = vpop.permute.xlu0 %177 }
 0x129   :  { %v152_v25 = vpop.f32.mrb[0].mxu0 }
 0x12a   :  { %v499_v26 = vpop.f32.mrb[1].mxu0  ;;  %v180_v29 = vmul.f32 %v173_v24, %v152_v25 }
 0x12b   :  { %v155_v28 = vpop.f32.mrb[2].mxu0 }
 0x12c   :  { %v181_v30 = vmul.f32 %v178_v27, %v155_v28  ;;  %v500_v31 = vpop.f32.mrb[3].mxu0 }
 0x12e   :  { %v182_v32 = vpack.c.bf16 %v181_v30, %v180_v29 }
 0x130   :  { %518 = vmatmul.mubr.bf16.vlgmr.msra.gmra.mrb[0].mxu1 %v182_v32 }
 0x149   :  { %v394_v33 = vpop.f32.mrb[4].mxu0 }
 0x14a   :  { %v539_v34 = vpop.f32.mrb[5].mxu0 }
 0x14b   :  { %v397_v35 = vpop.f32.mrb[6].mxu0 }
 0x14c   :  { %v540_v36 = vpop.f32.mrb[7].mxu0 }
 0x203   :  { %v299_v37 = vpop.f32.mrb[0].mxu1 }
 0x204   :  { %v395_v39 = vadd.f32 %v394_v33, %v299_v37  ;;  %v519_v40 = vpop.f32.mrb[1].mxu1 }
 0x205   :  { %v302_v41 = vpop.f32.mrb[2].mxu1 }
 0x206   :  { %v408_v42 = vadd.f32 %v462_v38, %v395_v39  ;;  %v398_v43 = vadd.f32 %v397_v35, %v302_v41  ;;  %v520_v44 = vpop.f32.mrb[3].mxu1 }
 0x208   :  { %v409_v45 = vadd.f32 %v462_v38, %v398_v43  ;;  %v410_v46 = vmax.f32 %v408_v42, 0.0 }
 0x20a   :  { %v411_v47 = vmax.f32 %v409_v45, 0.0 }
 0x20c   :  { %v470_v48 = vpack.c.bf16 %v411_v47, %v410_v46 }
 0x20e   :  { %471 = vst [vmem:[#allocation11] sm:$0xff] %v470_v48  }
 0x20f   :  { %671 = shalt.err (!%p668_p10)
}
 0x210   :  { %s672_s0 = scalar_lea.hbm %s878_s7, 128 }
 0x211   :  { %p673_p11 = scmp.ne.s32.totalorder %s878_s7, %s672_s0  ;;  %p676_p12 = scmp.lt.u32.totalorder %s672_s0, %s878_s7 }
 0x213   :  { %p678_p13 = pnand %p676_p12, %p673_p11 }
 0x215   :  { %681 = shalt.err (!%p678_p13)
}
 0x216   :  { %433 = dma.vmem_to_hbm [thread:$0]  %s428_s15, 128, %s878_s7, [#allocation5], %s692_s16, %s692_s16, %s693_s17  }
 0x217   :  { %688 = dma.done.wait [#allocation5], 128  }
 0x218   :  { %689 = vsyncadd [#allocation5], 4294967168 }
 0x219   :  { %437 = vsyncpa [#allocation4], 1 }
 0x21a   :  { %438 = vsyncpa [#allocation7], 1 }
 0x21b   :  { %439 = vsyncpa [#allocation10], 1 }
 0x21c   :  { %440 = vsyncpa [#allocation5], 1 }

</bundles_post_ra>
